<compile_context>
chip_gen: v7x
topology: tpu7x:2x2x1
jax: 0.10.0
libtpu: 0.0.40
codegen_flags: <defaults>
</compile_context>

<pallas_src>
import math
from functools import partial

import jax
import jax.numpy as jnp
from jax import lax
from jax.experimental import pallas as pl
from jax.experimental.pallas import tpu as pltpu


# ------------------------------------------------------------------ kernels --

def _layernorm_kernel(x_ref, g_ref, b_ref, o_ref, *, eps, feat):
    """Manual LayerNorm matching the PyTorch module exactly:
       a_2 * (x - mean) / (std + eps) + b_2, with unbiased (N-1) std."""
    x = x_ref[...].astype(jnp.float32)                         # (TR, D)
    mean = jnp.mean(x, axis=-1, keepdims=True)
    centered = x - mean
    var_unbiased = jnp.sum(centered * centered, axis=-1, keepdims=True) * (1.0 / (feat - 1))
    std = jnp.sqrt(var_unbiased)
    y = g_ref[...] * (centered / (std + eps)) + b_ref[...]
    o_ref[...] = y.astype(o_ref.dtype)


def _residual_add_kernel(x_ref, z_ref, o_ref):
    """Eval-mode (or p == 0) path: out = x + z."""
    o_ref[...] = x_ref[...] + z_ref[...]


def _mix_u32(x):
    """splitmix32-style finalizer; pure 32-bit integer VPU ops (portable)."""
    x = (x ^ (x >> jnp.uint32(16))) * jnp.uint32(0x7FEB352D)
    x = (x ^ (x >> jnp.uint32(15))) * jnp.uint32(0x846CA68B)
    x = x ^ (x >> jnp.uint32(16))
    return x


def _residual_dropout_add_kernel(seed_ref, x_ref, z_ref, o_ref, *, rate, tile_rows, feat):
    """Train-mode path: out = x + dropout(z), inverted-scaling dropout.

    Random bits come from a counter-based hash of the *global* element index,
    so the stream is tiling-independent and needs no hardware PRNG state."""
    keep_prob = 1.0 - rate
    seed = seed_ref[0].astype(jnp.uint32)
    row0 = (pl.program_id(0) * tile_rows).astype(jnp.uint32)
    r = lax.broadcasted_iota(jnp.int32, (tile_rows, feat), 0).astype(jnp.uint32)
    c = lax.broadcasted_iota(jnp.int32, (tile_rows, feat), 1).astype(jnp.uint32)
    idx = (row0 + r) * jnp.uint32(feat) + c
    bits = _mix_u32(idx ^ (seed * jnp.uint32(0x9E3779B9) + jnp.uint32(0x85EBCA6B)))
    threshold = jnp.uint32(min(int(round(keep_prob * 4294967296.0)), 4294967295))
    keep = bits < threshold                                     # P(keep) = 1 - rate
    z = jnp.where(keep, z_ref[...] * (1.0 / keep_prob), 0.0)
    o_ref[...] = (x_ref[...] + z).astype(o_ref.dtype)


# ----------------------------------------------------------------- wrappers --

def _row_tile(rows, prefer_steps=2, max_tile=1024):
    """Largest multiple-of-8 divisor of `rows` yielding >= prefer_steps grid
    steps (so a 2-TC chip gets work on both cores); falls back to the full
    extent, which is always a legal block shape."""
    for t in range(min(max_tile, rows // prefer_steps), 7, -1):
        if rows % t == 0 and t % 8 == 0:
            return t
    for t in range(min(max_tile, rows), 7, -1):
        if rows % t == 0 and t % 8 == 0:
            return t
    return rows


def layer_norm(x, a_2, b_2, eps=1e-6):
    """Pallas LayerNorm over the last axis; leading axes collapsed onto sublanes."""
    orig_shape = x.shape
    feat = orig_shape[-1]
    rows = math.prod(orig_shape[:-1])
    x2 = x.reshape(rows, feat)
    g2 = a_2.reshape(1, feat).astype(jnp.float32)
    b2 = b_2.reshape(1, feat).astype(jnp.float32)
    tr = _row_tile(rows)

    out = pl.pallas_call(
        partial(_layernorm_kernel, eps=float(eps), feat=feat),
        out_shape=jax.ShapeDtypeStruct((rows, feat), x.dtype),
        grid=(rows // tr,),
        in_specs=[
            pl.BlockSpec((tr, feat), lambda i: (i, 0)),
            pl.BlockSpec((1, feat), lambda i: (0, 0)),
            pl.BlockSpec((1, feat), lambda i: (0, 0)),
        ],
        out_specs=pl.BlockSpec((tr, feat), lambda i: (i, 0)),
        compiler_params=pltpu.CompilerParams(dimension_semantics=("parallel",)),
    )(x2, g2, b2)
    return out.reshape(orig_shape)


def residual_dropout_add(x, z, *, rate=0.0, train=False, seed=0):
    """out = x + dropout(z).  Eval mode / rate==0 lowers to a pure add kernel."""
    orig_shape = x.shape
    feat = orig_shape[-1]
    rows = math.prod(orig_shape[:-1])
    x2 = x.reshape(rows, feat)
    z2 = z.reshape(rows, feat)
    tr = _row_tile(rows)
    n_tiles = rows // tr

    if train and rate >= 1.0:
        # dropout(z) == 0 everywhere -> residual only
        return x

    if (not train) or rate <= 0.0:
        out = pl.pallas_call(
            _residual_add_kernel,
            out_shape=jax.ShapeDtypeStruct((rows, feat), x.dtype),
            grid=(n_tiles,),
            in_specs=[
                pl.BlockSpec((tr, feat), lambda i: (i, 0)),
                pl.BlockSpec((tr, feat), lambda i: (i, 0)),
            ],
            out_specs=pl.BlockSpec((tr, feat), lambda i: (i, 0)),
            compiler_params=pltpu.CompilerParams(dimension_semantics=("parallel",)),
        )(x2, z2)
    else:
        seeds = jnp.asarray([seed], dtype=jnp.int32)
        out = pl.pallas_call(
            partial(_residual_dropout_add_kernel, rate=float(rate),
                    tile_rows=tr, feat=feat),
            out_shape=jax.ShapeDtypeStruct((rows, feat), x.dtype),
            grid_spec=pltpu.PrefetchScalarGridSpec(
                num_scalar_prefetch=1,
                grid=(n_tiles,),
                in_specs=[
                    pl.BlockSpec((tr, feat), lambda i, s: (i, 0)),
                    pl.BlockSpec((tr, feat), lambda i, s: (i, 0)),
                ],
                out_specs=pl.BlockSpec((tr, feat), lambda i, s: (i, 0)),
            ),
            compiler_params=pltpu.CompilerParams(dimension_semantics=("parallel",)),
        )(seeds, x2, z2)
    return out.reshape(orig_shape)


def sublayer_connection_forward(x, sublayer, params, *, dropout=0.0, train=False, seed=0):
    """SublayerConnection.forward: x + dropout(sublayer(LayerNorm(x)))."""
    y = layer_norm(x, params["a_2"], params["b_2"], eps=params["eps"])
    z = sublayer(y)  # arbitrary user sublayer: plain JAX, outside the Pallas scope
    return residual_dropout_add(x, z, rate=dropout, train=train, seed=seed)


# ---------------------------------------------------------------- reference --

def reference_forward(x, sublayer, params):
    """Plain-JAX reference of the PyTorch module in eval mode (dropout=identity)."""
    mean = jnp.mean(x, axis=-1, keepdims=True)
    std = jnp.std(x, axis=-1, keepdims=True, ddof=1)            # torch.std: unbiased
    y = params["a_2"] * (x - mean) / (std + params["eps"]) + params["b_2"]
    return x + sublayer(y)


if __name__ == "__main__":
    B, S, D = 2, 16, 128          # batch, seq, model size (lane-dense feature dim)
    key = jax.random.PRNGKey(0)
    kx, kw, kb, kg = jax.random.split(key, 4)

    x = jax.random.normal(kx, (B, S, D), jnp.float32)

    # LayerNorm params (torch init is ones/zeros) -- perturb so they matter.
    params = {
        "a_2": jnp.ones((D,), jnp.float32) + 0.1 * jax.random.normal(kg, (D,), jnp.float32),
        "b_2": 0.1 * jax.random.normal(kb, (D,), jnp.float32),
        "eps": 1e-6,
    }

    # Demo sublayer: a size-preserving linear map (the sublayer is a free
    # parameter of forward(), so it stays a plain-JAX callable between kernels).
    W = jax.random.normal(kw, (D, D), jnp.float32) / math.sqrt(D)
    bias = jnp.zeros((D,), jnp.float32)
    sublayer = lambda h: jnp.dot(h, W) + bias

    # Eval-mode forward (dropout is identity) -> validate against the reference.
    out = sublayer_connection_forward(x, sublayer, params, dropout=0.1, train=False)
    out = jax.block_until_ready(out)
    ref = jax.block_until_ready(reference_forward(x, sublayer, params))
    assert out.shape == ref.shape == (B, S, D), (out.shape, ref.shape)
    assert jnp.allclose(out, ref, atol=1e-4, rtol=1e-4), float(jnp.max(jnp.abs(out - ref)))

    # Train-mode smoke test (counter-hash dropout): shape + finiteness only,
    # since the PRNG stream cannot match torch's.
    out_tr = jax.block_until_ready(
        sublayer_connection_forward(x, sublayer, params, dropout=0.5, train=True, seed=42))
    assert out_tr.shape == (B, S, D)
    assert bool(jnp.all(jnp.isfinite(out_tr)))
    # Dropout should actually zero-out some sublayer contributions: the train
    # output must differ from the eval output.
    assert not bool(jnp.allclose(out_tr, ref))

    print("KERNEL_OK")
</pallas_src>

<mosaic_0001>
module attributes {stable_mosaic.version = 11 : i64} {
  func.func @_layernorm_kernel(%arg0: i32, %arg1: memref<16x128xf32, #tpu.memory_space<vmem>>, %arg2: memref<1x128xf32, #tpu.memory_space<vmem>>, %arg3: memref<1x128xf32, #tpu.memory_space<vmem>>, %arg4: memref<16x128xf32, #tpu.memory_space<vmem>>) attributes {dimension_semantics = [#tpu.dimension_semantics<parallel>], iteration_bounds = array<i64: 2>, scalar_prefetch = 0 : i64, scratch_operands = 0 : i64, tpu.core_type = #tpu.core_type<tc>, window_params = [{transform_indices = @transform_0, window_bounds = array<i64: 16, 128>}, {pipeline_mode = #tpu.pipeline_mode<synchronous>, transform_indices = @transform_1, window_bounds = array<i64: 1, 128>}, {pipeline_mode = #tpu.pipeline_mode<synchronous>, transform_indices = @transform_2, window_bounds = array<i64: 1, 128>}, {transform_indices = @transform_3, window_bounds = array<i64: 16, 128>}]} {
    %c0 = arith.constant 0 : index
    %c0_0 = arith.constant 0 : index
    %0 = vector.load %arg1[%c0, %c0_0] : memref<16x128xf32, #tpu.memory_space<vmem>>, vector<16x128xf32>
    %cst = arith.constant dense<0.000000e+00> : vector<16xf32>
    %1 = vector.multi_reduction <add>, %0, %cst [1] : vector<16x128xf32> to vector<16xf32>
    %2 = vector.shape_cast %1 : vector<16xf32> to vector<16x1xf32>
    %cst_1 = arith.constant 1.280000e+02 : f32
    %3 = vector.broadcast %cst_1 : f32 to vector<16x1xf32>
    %4 = arith.divf %2, %3 : vector<16x1xf32>
    %5 = vector.broadcast %4 : vector<16x1xf32> to vector<16x128xf32>
    %6 = arith.subf %0, %5 : vector<16x128xf32>
    %7 = arith.mulf %6, %6 : vector<16x128xf32>
    %cst_2 = arith.constant dense<0.000000e+00> : vector<16xf32>
    %8 = vector.multi_reduction <add>, %7, %cst_2 [1] : vector<16x128xf32> to vector<16xf32>
    %9 = vector.shape_cast %8 : vector<16xf32> to vector<16x1xf32>
    %cst_3 = arith.constant 0.00787401571 : f32
    %10 = vector.broadcast %cst_3 : f32 to vector<16x1xf32>
    %11 = arith.mulf %9, %10 : vector<16x1xf32>
    %12 = math.sqrt %11 : vector<16x1xf32>
    %c0_4 = arith.constant 0 : index
    %c0_5 = arith.constant 0 : index
    %13 = vector.load %arg2[%c0_4, %c0_5] : memref<1x128xf32, #tpu.memory_space<vmem>>, vector<1x128xf32>
    %cst_6 = arith.constant 9.99999997E-7 : f32
    %14 = vector.broadcast %cst_6 : f32 to vector<16x1xf32>
    %15 = arith.addf %12, %14 : vector<16x1xf32>
    %16 = vector.broadcast %15 : vector<16x1xf32> to vector<16x128xf32>
    %17 = arith.divf %6, %16 : vector<16x128xf32>
    %18 = vector.broadcast %13 : vector<1x128xf32> to vector<16x128xf32>
    %19 = arith.mulf %18, %17 : vector<16x128xf32>
    %c0_7 = arith.constant 0 : index
    %c0_8 = arith.constant 0 : index
    %20 = vector.load %arg3[%c0_7, %c0_8] : memref<1x128xf32, #tpu.memory_space<vmem>>, vector<1x128xf32>
    %21 = vector.broadcast %20 : vector<1x128xf32> to vector<16x128xf32>
    %22 = arith.addf %19, %21 : vector<16x128xf32>
    %c0_9 = arith.constant 0 : index
    %c0_10 = arith.constant 0 : index
    %23 = vector.load %arg4[%c0_9, %c0_10] : memref<16x128xf32, #tpu.memory_space<vmem>>, vector<16x128xf32>
    tpu.vector_store %arg4[%c0_9, %c0_10], %22 {strides = array<i32>} : memref<16x128xf32, #tpu.memory_space<vmem>>, vector<16x128xf32>,
    return
  }
  func.func @transform_0(%arg0: i32) -> (i32, i32) {
    %c0_i32 = arith.constant 0 : i32
    %c0_i32_0 = arith.constant 0 : i32
    return %arg0, %c0_i32 : i32, i32
  }
  func.func @transform_1(%arg0: i32) -> (i32, i32) {
    %c0_i32 = arith.constant 0 : i32
    %c0_i32_0 = arith.constant 0 : i32
    %c0_i32_1 = arith.constant 0 : i32
    return %c0_i32, %c0_i32_0 : i32, i32
  }
  func.func @transform_2(%arg0: i32) -> (i32, i32) {
    %c0_i32 = arith.constant 0 : i32
    %c0_i32_0 = arith.constant 0 : i32
    %c0_i32_1 = arith.constant 0 : i32
    return %c0_i32, %c0_i32_0 : i32, i32
  }
  func.func @transform_3(%arg0: i32) -> (i32, i32) {
    %c0_i32 = arith.constant 0 : i32
    %c0_i32_0 = arith.constant 0 : i32
    return %arg0, %c0_i32 : i32, i32
  }
}

</mosaic_0001>

<bundles_post_ra>
// kernel: tpu_custom_call.1
= control target key start
LH: loop header
LB: loop body
LE: loop exit
PB: predicated region body
PF: predicated region fallthrough
CT: control target
= control target key end

     0   :  { %8 = vsyncpa [#allocation3], 0  ;;  %s709_s0 = inlined_call_operand.hbm [shape: f32[32,128], index: 0, kind: input, shape index: {}]   ;;  %s710_s1 = inlined_call_operand.vmem [shape: f32[1,128], index: 1, kind: input, shape index: {}]   ;;  %s711_s2 = inlined_call_operand.vmem [shape: f32[1,128], index: 2, kind: input, shape index: {}]   ;;  %s712_s3 = inlined_call_operand.hbm [shape: f32[32,128], index: 3, kind: output, shape index: {}]  }
   0x1   :  { %10 = vsyncpa [#allocation3 + $0x1], 0 }
   0x2   :  { %11 = vsyncpa [#allocation4], 0 }
   0x3   :  { %13 = vsyncpa [#allocation4 + $0x1], 0  ;;  %s537_s12 = smov 0   ;;  %s539_s13 = smov 0  }
   0x4   :  { %s541_s14 = smov 0   ;;  %s543_s15 = smov 0  }
   0x5 LB: > { %s558_s16 = sadd.s32 4294967295, %s509_s15   ;;  %s337_s17 = sadd.s32 4294967294, %s509_s15   ;;  %s509_s15 = sphi %s543_s15, %s725_s15   ;;  %s505_s14 = sphi %s541_s14, %s724_s14   ;;  %s501_s13 = sphi %s539_s13, %s723_s13   ;;  %s497_s12 = sphi %s537_s12, %s722_s12  }
   0x6   : > { %s562_s18 = sadd.s32 1, %s509_s15   ;;  %s26_s19 = sadd.s32 1, %s505_s14 }
   0x7   : > { %s23_s20 = ssub.s32 %s509_s15, %s562_s18  ;;  %p33_p0 = scmp.ne.s32.totalorder %s505_s14, %s501_s13 }
   0x8   : > { %p24_p1 = scmp.eq.s32.totalorder %s23_s20, 0  ;;  %p34_p2 = scmp.eq.s32.totalorder %s509_s15, 0 }
   0x9   : > { %p39_p3 = scmp.ne.s32.totalorder %s501_s13, %s497_s12  ;;  %p40_p4 = scmp.eq.s32.totalorder %s558_s16, 0 }
   0xa   : > { %s574_s21 = scalar_select %p24_p1, %s505_s14, %s26_s19  }
   0xb   : > { %p576_p5 = por %p34_p2, %p33_p0  ;;  %p580_p6 = por %p40_p4, %p39_p3 }
   0xc   : > { %p105_p7 = scmp.eq.s32.totalorder %s558_s16, 1  ;;  %p111_p8 = scmp.eq.s32.totalorder %s337_s17, 1 }
   0xd   : > { %p367_p10 = scmp.lt.s32.totalorder %s509_s15, 2  ;;  %s137_s26 = sand.u32 1, %s505_s14  }
   0xe   : > { %p587_p11 = por %p105_p7, %p33_p0  ;;  %p591_p12 = por %p111_p8, %p39_p3 }
   0xf   : > { %s353_s27 = sshll.u32 %s509_s15, 8  ;;  %s340_s28 = sshll.u32 %s137_s26, 4 }
  0x10   : > { %s716_s24 = scalar_select %p587_p11, 1, 0 }
  0x11   : > { %s717_s25 = scalar_select %p591_p12, 1, 0 }
  0x12   : > { %s600_s4 = scalar_lea.hbm %s709_s0, %s353_s27  ;;  %s141_s5 = scalar_lea.vmem [#allocation2], %s340_s28 }
  0x13   : > { %s148_s6 = sshll.u32 %s141_s5, 4  ;;  %p604_p13 = pnand %p367_p10, %p576_p5  ;;  %s608_s6 = int_to_ptr.vmem [resolvable:$true] %s148_s6 }
  0x14   : > { %s610_s8 = scalar_lea.sflag [#allocation3], %s137_s26  ;;  %s413_s9 = scalar_lea.hbm %s600_s4, 256 }
  0x15   : > { %p414_p0 = scmp.ne.s32.totalorder %s600_s4, %s413_s9  ;;  %p415_p1 = pneg %p604_p13 }
  0x16   : > { %s418_s17 = scalar_lea.hbm %s709_s0, 512  ;;  %p419_p4 = scmp.lt.u32.totalorder %s600_s4, %s709_s0 }
  0x17   : > { %p416_p2 = pnand %p415_p1, %p414_p0  ;;  %p420_p5 = scmp.lt.u32.totalorder %s418_s17, %s413_s9 }
  0x18   : > { %p422_p8 = scmp.lt.u32.totalorder %s413_s9, %s600_s4 }
  0x19   : > { %p417_p3 = pneg %p416_p2  ;;  %p421_p7 = por %p420_p5, %p419_p4 }
  0x1b   : > { %p423_p10 = por %p422_p8, %p421_p7 }
  0x1d   : > { %p424_p9 = pnand %p423_p10, %p417_p3 }
  0x1f   : > { %427 = shalt.err (!%p424_p9)
}
  0x20   : > { %s428_s22 = scalar_lea.vmem %s608_s6, 256  ;;  %s511_s26 = smov [#allocation2]  }
  0x21   : > { %p429_p0 = scmp.ne.s32.totalorder %s608_s6, %s428_s22  ;;  %s433_s27 = sshll.u32 %s511_s26, 4  ;;  %s434_s27 = int_to_ptr.vmem [resolvable:$false] %s433_s27 }
  0x22   : > { %s435_s28 = scalar_lea.vmem %s434_s27, 512  ;;  %p436_p11 = scmp.lt.s32.totalorder %s608_s6, %s434_s27 }
  0x23   : > { %p431_p2 = pnand %p429_p0, %p415_p1  ;;  %p437_p4 = scmp.lt.s32.totalorder %s435_s28, %s428_s22 }
  0x25   : > { %p432_p12 = pneg %p431_p2  ;;  %p438_p5 = por %p437_p4, %p436_p11 }
  0x27   : > { %p439_p7 = pnand %p438_p5, %p432_p12 }
  0x29   : > { %442 = shalt.err (!%p439_p7)
}
  0x2a   : > { %s512_s29 = smov 128   ;;  %s513_s30 = smov 8  }
  0x2b   : > { %362 = dma.hbm_to_vmem [thread:$0]  (!%p604_p13), %s600_s4, 256, %s608_s6, %s610_s8, %s512_s29, %s512_s29, %s513_s30  }
  0x2c   : > { %p343_p9 = scmp.ge.s32.totalorder %s509_s15, 1  ;;  %p156_p1 = scmp.lt.s32.totalorder %s509_s15, 3 }
  0x2e   : > { %p157_p3 = pnand %p343_p9, %p156_p1 }
  0x2f   : > { %s641_s5 = sand.u32 (!%p157_p3), 1, %s501_s13  }
  0x30   : > { %160 = sbr.rel (%p157_p3) target bundleno = 402 (0x192), region = 32  ;;  %s344_s9 = sshll.u32 (!%p157_p3), %s641_s5, 4 }
  0x31   : > { %s163_s10 = scalar_lea.sflag (!%p157_p3), [#allocation3], %s641_s5  ;;  %s166_s11 = scalar_lea.vmem (!%p157_p3), [#allocation2], %s344_s9 }
  0x37   : > { %488 = dma.done.wait (%p580_p6), %s163_s10, 256  }
  0x38   : > { %490 = vsyncadd (%p580_p6), %s163_s10, 4294967040  ;;  %v191_v0 = vld [vmem:[%s166_s11] sm:$0xff]  ;;  %v192_v1 = vld [vmem:[%s166_s11 + $0x8] sm:$0xff]  ;;  %s354_s8 = sshll.u32 %s558_s16, 8  ;;  %s188_s17 = scalar_lea.vmem [#allocation5], %s344_s9 }
  0x39   : > { %193 = vadd.xlane.f32.xlu0 %v191_v0  ;;  %v346_v27 = vld [vmem:[%s710_s1] ss:$0 sm:$0xff]  ;;  %s264_s19 = sshll.u32 %s188_s17, 4  ;;  %s663_s26 = scalar_lea.hbm %s712_s3, %s354_s8  ;;  %s665_s19 = int_to_ptr.vmem [resolvable:$true] %s264_s19 }
  0x3a   : > { %v347_v29 = vld [vmem:[%s711_s2] ss:$0 sm:$0xff]  ;;  %s251_s27 = scalar_lea.sflag [#allocation4], %s641_s5  ;;  %s443_s28 = scalar_lea.vmem %s665_s19, 256 }
  0x3b   : > { %p444_p6 = scmp.ne.s32.totalorder %s665_s19, %s443_s28  ;;  %p719_p11 = scmp.ne.s32.totalorder %s716_s24, 0 }
  0x3c   : > { %s514_s16 = smov [#allocation5]  }
  0x3d   : > { %195 = vadd.xlane.f32.xlu0 %v192_v1  ;;  %p445_p12 = pnand %p444_p6, %p719_p11  ;;  %s447_s29 = sshll.u32 %s514_s16, 4  ;;  %s448_s29 = int_to_ptr.vmem [resolvable:$false] %s447_s29 }
  0x3e   : > { %s449_s30 = scalar_lea.vmem %s448_s29, 512  ;;  %p450_p8 = scmp.lt.s32.totalorder %s665_s19, %s448_s29 }
  0x3f   : > { %p446_p13 = pneg %p445_p12  ;;  %p451_p10 = scmp.lt.s32.totalorder %s449_s30, %s443_s28 }
  0x41   : > { %p452_p0 = por %p451_p10, %p450_p8 }
  0x43   : > { %p453_p2 = pnand %p452_p0, %p446_p13 }
  0xc6   : > { %v194_v2 = vpop.xlane.xlu0 %193 }
  0xc7   : > { %v198_v3 = vmul.f32 0.0078125, %v194_v2 }
  0xc9   : > { %v200_v4 = vsub.f32 %v191_v0, %v198_v3 }
  0xca   : > { %v196_v5 = vpop.xlane.xlu0 %195 }
  0xcb   : > { %v199_v6 = vmul.f32 0.0078125, %v196_v5  ;;  %v202_v7 = vmul.f32 %v200_v4, %v200_v4 }
  0xcd   : > { %v201_v8 = vsub.f32 %v192_v1, %v199_v6  ;;  %204 = vadd.xlane.f32.xlu1 %v202_v7 }
  0xcf   : > { %v203_v9 = vmul.f32 %v201_v8, %v201_v8 }
  0xd1   : > { %206 = vadd.xlane.f32.xlu1 %v203_v9 }
 0x15a   : > { %v205_v10 = vpop.xlane.xlu1 %204 }
 0x15b   : > { %v208_v11 = vmul.f32 0.007874016, %v205_v10 }
 0x15d   : > { %405 = vrsqrt.f32 %v208_v11  ;;  %vm212_vm0 = vcmp.eq.f32.partialorder %v208_v11, inf  ;;  %v215_v16 = vand.u32 2147483648, %v208_v11  ;;  %vm214_vm1 = vcmp.eq.f32.partialorder %v208_v11, 0.0 }
 0x15e   : > { %v207_v12 = vpop.xlane.xlu1 %206 }
 0x15f   : > { %v209_v13 = vmul.f32 0.007874016, %v207_v12 }
 0x161   : > { %407 = vrsqrt.f32 %v209_v13  ;;  %vm219_vm2 = vcmp.eq.f32.partialorder %v209_v13, inf  ;;  %v222_v22 = vand.u32 2147483648, %v209_v13  ;;  %vm221_vm3 = vcmp.eq.f32.partialorder %v209_v13, 0.0 }
 0x167   : > { %v406_v14 = vpop.eup %405 }
 0x168   : > { %v211_v15 = vmul.f32 %v406_v14, %v208_v11 }
 0x16a   : > { %v213_v17 = vsel %vm212_vm0, %v208_v11, %v211_v15 }
 0x16b   : > { %v408_v18 = vpop.eup %407  ;;  %v216_v19 = vsel %vm214_vm1, %v215_v16, %v213_v17 }
 0x16c   : > { %v225_v20 = vadd.f32 1e-06, %v216_v19  ;;  %v218_v21 = vmul.f32 %v408_v18, %v209_v13 }
 0x16e   : > { %409 = vrcp.f32 %v225_v20  ;;  %v220_v23 = vsel %vm219_vm2, %v209_v13, %v218_v21 }
 0x16f   : > { %v223_v24 = vsel %vm221_vm3, %v222_v22, %v220_v23 }
 0x170   : > { %v226_v25 = vadd.f32 1e-06, %v223_v24 }
 0x172   : > { %411 = vrcp.f32 %v226_v25 }
 0x178   : > { %v410_v26 = vpop.eup %409 }
 0x179   : > { %v228_v28 = vmul.f32 %v410_v26, %v200_v4 }
 0x17b   : > { %v237_v30 = vmul.f32 %v346_v27, %v228_v28 }
 0x17c   : > { %v412_v31 = vpop.eup %411 }
 0x17d   : > { %v230_v32 = vmul.f32 %v412_v31, %v201_v8  ;;  %v246_v33 = vadd.f32 %v347_v29, %v237_v30 }
 0x17f   : > { %v238_v34 = vmul.f32 %v346_v27, %v230_v32  ;;  %248 = vst [vmem:[%s188_s17] sm:$0xff] %v246_v33 }
 0x181   : > { %v247_v35 = vadd.f32 %v347_v29, %v238_v34 }
 0x183   : > { %249 = vst [vmem:[%s188_s17 + $0x8] sm:$0xff] %v247_v35 }
 0x184   : > { %456 = shalt.err (!%p453_p2)
}
 0x185   : > { %s457_s9 = scalar_lea.hbm %s663_s26, 256  ;;  %s461_s23 = scalar_lea.hbm %s712_s3, 512 }
 0x186   : > { %p458_p4 = scmp.ne.s32.totalorder %s663_s26, %s457_s9  ;;  %p462_p9 = scmp.lt.u32.totalorder %s663_s26, %s712_s3 }
 0x187   : > { %p463_p1 = scmp.lt.u32.totalorder %s461_s23, %s457_s9  ;;  %p465_p6 = scmp.lt.u32.totalorder %s457_s9, %s663_s26 }
 0x188   : > { %p459_p5 = pnand %p458_p4, %p719_p11 }
 0x189   : > { %p464_p3 = por %p463_p1, %p462_p9 }
 0x18a   : > { %p460_p7 = pneg %p459_p5 }
 0x18b   : > { %p466_p12 = por %p465_p6, %p464_p3 }
 0x18d   : > { %p467_p13 = pnand %p466_p12, %p460_p7 }
 0x18f   : > { %470 = shalt.err (!%p467_p13)
}
 0x190   : > { %s515_s7 = smov 128   ;;  %s516_s8 = smov 8  }
 0x191   : > { %357 = dma.vmem_to_hbm [thread:$0]  (%p719_p11), %s665_s19, 256, %s663_s26, %s251_s27, %s515_s7, %s515_s7, %s516_s8  }
 0x192 PF: > { %s279_s17 = sand.u32 1, %s497_s12   ;;  %p720_p8 = scmp.ne.s32.totalorder %s717_s25, 0 }
 0x193   : > { %p721_p10 = scmp.ge.s32.totalorder %s509_s15, 2  ;;  %s280_s20 = scalar_lea.sflag [#allocation4], %s279_s17 }
 0x195   : > { %p364_p0 = pnand %p721_p10, %p720_p8 }
 0x197   : > { %492 = dma.done.wait (!%p364_p0), %s280_s20, 256  }
 0x198   : > { %494 = vsyncadd (!%p364_p0), %s280_s20, 4294967040  ;;  %p16_p2 = scmp.ge.s32.totalorder %s562_s18, 4   ;;  %s722_s12 = smov %s501_s13 }
 0x199   : > { %s723_s13 = smov %s505_s14  ;;  %s724_s14 = smov %s574_s21 }
 0x19a   : > { %s725_s15 = smov %s562_s18  ;;  %18 = sbr.rel (!%p16_p2) target bundleno = 5 (0x5), region = 77 }
 0x1a1   :  { %285 = vsyncpa [#allocation3], 1 }
 0x1a2   :  { %287 = vsyncpa [#allocation3 + $0x1], 1 }
 0x1a3   :  { %288 = vsyncpa [#allocation4], 1 }
 0x1a4   :  { %290 = vsyncpa [#allocation4 + $0x1], 1 }

</bundles_post_ra>
